<compile_context>
chip_gen: v6e
topology: v6e:2x2x1
jax: 0.10.0
libtpu: 0.0.40
codegen_flags: <defaults>
</compile_context>

<pallas_src>
import functools

import jax
import jax.numpy as jnp
from jax.experimental import pallas as pl
from jax.experimental.pallas import tpu as pltpu

TIME_EMBED_SIZE = 8


# ------------------------------------------------------------------ small helpers

def _round_up(v, m):
    return ((v + m - 1) // m) * m


def _vmem_capacity_bytes():
    """Physical VMEM per core; conservative (v7x-sized) fallback if query fails."""
    try:
        cap = int(getattr(pltpu.get_tpu_info(), "vmem_capacity_bytes", 0))
        if cap > 0:
            return cap
    except Exception:
        pass
    return 64 << 20


def _vmem_estimate(tile, I, Hp, E):
    """Scoped-VMEM footprint: activations double-buffered, weights single-buffered,
    plus f32 in-kernel intermediates and compiler headroom."""
    bf, f4 = 2, 4
    acts = 2 * tile * (I * bf + Hp * f4 + E * bf + Hp * f4)        # x, h, delt in + out
    wgts = (I * 4 * Hp + Hp * 3 * Hp + E * Hp) * bf + 4 * Hp * f4  # bf16 slabs + f32 bias
    tmps = tile * (8 * Hp) * f4                                    # gx/gh/gt + gate temps
    return acts + wgts + tmps + (2 << 20)


def _const_spec(shape, single_buffer):
    """BlockSpec for a grid-invariant operand; single-buffer it when supported."""
    index_map = lambda i: (0,) * len(shape)
    if single_buffer:
        try:
            return pl.BlockSpec(shape, index_map, pipeline_mode=pl.Buffered(1))
        except (TypeError, AttributeError):
            pass
    return pl.BlockSpec(shape, index_map)


# ------------------------------------------------------------------------- kernel

def _time_gru_kernel(x_ref, h_ref, d_ref, wx_ref, wh_ref, wt_ref, b_ref, out_ref, *, hp):
    """One batch tile. Gate column layout of the x-side slab: [ r | z | c | t ] * Hp."""
    Hp = hp
    x = x_ref[...]                                   # [tile, I]   bf16
    h = h_ref[...]                                   # [tile, Hp]  f32 (state)
    d = d_ref[...]                                   # [tile, E]   bf16

    # Three lane-dense MXU passes: bf16 operands, f32 accumulation.
    gx = jnp.dot(x, wx_ref[...], preferred_element_type=jnp.float32) + b_ref[...]
    gh = jnp.dot(h.astype(jnp.bfloat16), wh_ref[...],
                 preferred_element_type=jnp.float32)
    gt = jnp.dot(d, wt_ref[...], preferred_element_type=jnp.float32)

    r = jax.nn.sigmoid(gx[:, 0:Hp] + gh[:, 0:Hp])
    z = jax.nn.sigmoid(gx[:, Hp:2 * Hp] + gh[:, Hp:2 * Hp])
    # time gate: the inner sigmoid applies to the delt projection alone
    T = jax.nn.sigmoid(gx[:, 3 * Hp:4 * Hp] + jax.nn.sigmoid(gt))
    # cell gate: r multiplies only the h projection
    n = jnp.tanh(gx[:, 2 * Hp:3 * Hp] + r * gh[:, 2 * Hp:3 * Hp]) * T

    # (1 - z) * n + z * h  ==  n + z * (h - n)   (one fewer VPU op per element)
    out_ref[...] = (n + z * (h - n)).astype(out_ref.dtype)


# ---------------------------------------------------------------- parameter packing

def pack_params(params, hidden):
    """Pack the 14 nn.Linear tensors into fused, lane-padded bf16 slabs + f32 bias."""
    (wrx, brx, wrh, brh,
     wzx, bzx, wzh, bzh,
     wcx, bcx, wch,
     wtx, btx, wtt) = params
    H = hidden
    E = wtt.shape[0]
    Hp = _round_up(H, 128)  # lane-pad each gate block so slices / stores are lane-dense

    def padc(w):  # pad the output (column) dim H -> Hp with zeros
        return jnp.pad(w, ((0, 0), (0, Hp - H))) if Hp != H else w

    wx = jnp.concatenate([padc(wrx), padc(wzx), padc(wcx), padc(wtx)], axis=1)  # [I, 4Hp]
    wh = jnp.concatenate([padc(wrh), padc(wzh), padc(wch)], axis=1)             # [H, 3Hp]
    if Hp != H:
        wh = jnp.pad(wh, ((0, Hp - H), (0, 0)))                                 # [Hp, 3Hp]
    wt = padc(wtt)                                                              # [E, Hp]
    # Pre-summed biases (x-side + h-side), kept f32, added once post-matmul.
    bias = jnp.concatenate([padc(brx + brh), padc(bzx + bzh),
                            padc(bcx), padc(btx)], axis=1)                      # [1, 4Hp]

    return (wx.astype(jnp.bfloat16), wh.astype(jnp.bfloat16),
            wt.astype(jnp.bfloat16), bias.astype(jnp.float32), Hp)


# ------------------------------------------------------------------------ wrapper

def time_gru_forward(x, h, delt, packed, *, batch_tile=None):
    """x: [B, I] f32, h: [B, H] f32, delt: [B, E] f32  ->  h_next [B, H] f32."""
    wx, wh, wt, bias, Hp = packed
    B, I = x.shape
    H = h.shape[1]
    E = delt.shape[1]
    assert wx.shape == (I, 4 * Hp) and wh.shape == (Hp, 3 * Hp)
    assert wt.shape == (E, Hp) and bias.shape == (1, 4 * Hp)

    # bf16 MXU operands (weights already bf16 from pack_params).
    xb = x.astype(jnp.bfloat16)
    db = delt.astype(jnp.bfloat16)
    # h stays f32; pad gate columns to Hp lanes only when H % 128 != 0 (tiny copy).
    h_in = jnp.pad(h, ((0, 0), (0, Hp - H))) if Hp != H else h

    vmem_cap = _vmem_capacity_bytes()
    budget = min(int(0.8 * vmem_cap), 100 << 20)
    max_tile = 512 if vmem_cap >= (100 << 20) else 256  # v5e/v6e: 128 MiB, v7x: 64 MiB

    if batch_tile is None:
        if B <= 8:
            batch_tile = B
        else:
            # At least two tiles so v7x's two TensorCores both get work.
            batch_tile = min(max_tile, _round_up(pl.cdiv(B, 2), 8))
    batch_tile = min(batch_tile, B)
    if batch_tile != B:
        batch_tile = max(8, _round_up(batch_tile, 8))
    # Shrink the tile if the footprint would exceed the per-generation VMEM budget.
    while batch_tile > 8 and _vmem_estimate(batch_tile, I, Hp, E) > budget:
        batch_tile = max(8, _round_up(batch_tile // 2, 8))

    tile = batch_tile
    num_tiles = pl.cdiv(B, tile)

    est = _vmem_estimate(tile, I, Hp, E)
    cp_kwargs = dict(dimension_semantics=("parallel",))
    # v5e's default scoped VMEM limit is only 16 MiB: raise explicitly when needed,
    # but never below 32 MiB and never above ~80% of physical VMEM.
    if est > (12 << 20):
        cp_kwargs["vmem_limit_bytes"] = int(min(max(int(est * 1.25), 32 << 20), budget))

    batch_specs = [
        pl.BlockSpec((tile, I), lambda i: (i, 0)),   # x     (bf16)
        pl.BlockSpec((tile, Hp), lambda i: (i, 0)),  # h     (f32)
        pl.BlockSpec((tile, E), lambda i: (i, 0)),   # delt  (bf16)
    ]
    out_spec = pl.BlockSpec((tile, Hp), lambda i: (i, 0))
    weight_shapes = [(I, 4 * Hp), (Hp, 3 * Hp), (E, Hp), (1, 4 * Hp)]

    def build(single_buffer_weights):
        wspecs = [_const_spec(s, single_buffer_weights) for s in weight_shapes]
        return pl.pallas_call(
            functools.partial(_time_gru_kernel, hp=Hp),
            out_shape=jax.ShapeDtypeStruct((B, Hp), jnp.float32),
            grid_spec=pltpu.PrefetchScalarGridSpec(
                num_scalar_prefetch=0,
                grid=(num_tiles,),
                in_specs=batch_specs + wspecs,
                out_specs=out_spec,
            ),
            compiler_params=pltpu.CompilerParams(**cp_kwargs),
        )

    args = (xb, h_in, db, wx, wh, wt, bias)
    try:
        out = build(True)(*args)
    except Exception:
        # Fallback for JAX versions without pipeline_mode / pl.Buffered(1) support.
        out = build(False)(*args)

    return out[:, :H] if Hp != H else out


# -------------------------------------------------------------- params & references

def make_params(key, input_length, hidden_length):
    """Deterministic parameter init. Weights stored transposed: [in, out]."""
    ks = jax.random.split(key, 14)

    def lin_w(k, fan_in, fan_out):
        bound = 1.0 / jnp.sqrt(fan_in)
        return jax.random.uniform(k, (fan_in, fan_out), jnp.float32, -bound, bound)

    def lin_b(k, fan_in, fan_out):
        bound = 1.0 / jnp.sqrt(fan_in)
        return jax.random.uniform(k, (1, fan_out), jnp.float32, -bound, bound)

    I, H, E = input_length, hidden_length, TIME_EMBED_SIZE
    wrx, brx = lin_w(ks[0], I, H), lin_b(ks[1], I, H)
    wrh, brh = lin_w(ks[2], H, H), lin_b(ks[3], H, H)
    wzx, bzx = lin_w(ks[4], I, H), lin_b(ks[5], I, H)
    wzh, bzh = lin_w(ks[6], H, H), lin_b(ks[7], H, H)
    wcx, bcx = lin_w(ks[8], I, H), lin_b(ks[9], I, H)
    wch = lin_w(ks[10], H, H)                       # no bias
    wtx, btx = lin_w(ks[11], I, H), lin_b(ks[12], I, H)
    wtt = lin_w(ks[13], E, H)                       # no bias
    return (wrx, brx, wrh, brh, wzx, bzx, wzh, bzh,
            wcx, bcx, wch, wtx, btx, wtt)


def time_gru_reference(x, h, delt, params):
    """Pure-JAX full-f32 reference (unfused, original ordering)."""
    (wrx, brx, wrh, brh, wzx, bzx, wzh, bzh,
     wcx, bcx, wch, wtx, btx, wtt) = params
    r = jax.nn.sigmoid(x @ wrx + brx + h @ wrh + brh)
    z = jax.nn.sigmoid(x @ wzx + bzx + h @ wzh + bzh)
    T = jax.nn.sigmoid(x @ wtx + btx + jax.nn.sigmoid(delt @ wtt))
    n = jnp.tanh(x @ wcx + bcx + r * (h @ wch)) * T
    return (1.0 - z) * n + z * h


def time_gru_reference_packed(x, h, delt, packed, hidden):
    """Reference using the same bf16-quantized matmul operands as the kernel."""
    wx, wh, wt, bias, Hp = packed
    H = hidden
    wx = wx.astype(jnp.float32)
    wh = wh.astype(jnp.float32)
    wt = wt.astype(jnp.float32)
    xb = x.astype(jnp.bfloat16).astype(jnp.float32)
    db = delt.astype(jnp.bfloat16).astype(jnp.float32)
    h_pad = jnp.pad(h, ((0, 0), (0, Hp - H))) if Hp != H else h
    hb = h_pad.astype(jnp.bfloat16).astype(jnp.float32)

    gx = xb @ wx + bias
    gh = hb @ wh
    gt = db @ wt
    r = jax.nn.sigmoid(gx[:, 0:Hp] + gh[:, 0:Hp])
    z = jax.nn.sigmoid(gx[:, Hp:2 * Hp] + gh[:, Hp:2 * Hp])
    T = jax.nn.sigmoid(gx[:, 3 * Hp:4 * Hp] + jax.nn.sigmoid(gt))
    n = jnp.tanh(gx[:, 2 * Hp:3 * Hp] + r * gh[:, 2 * Hp:3 * Hp]) * T
    out = n + z * (h_pad - n)
    return out[:, :H]


# ---------------------------------------------------------------------------- main

if __name__ == "__main__":
    batch = 16
    input_length = 16
    hidden_length = 32

    key = jax.random.PRNGKey(0)
    kx, kh, kd, kp = jax.random.split(key, 4)

    x = jax.random.normal(kx, (batch, input_length), jnp.float32)
    h = jax.random.normal(kh, (batch, hidden_length), jnp.float32)
    delt = jax.random.normal(kd, (batch, TIME_EMBED_SIZE), jnp.float32)
    params = make_params(kp, input_length, hidden_length)
    packed = pack_params(params, hidden_length)

    h_next = jax.block_until_ready(time_gru_forward(x, h, delt, packed))
    assert h_next.shape == (batch, hidden_length)

    # Tight check vs a reference using the same bf16-quantized matmul operands.
    ref_q = time_gru_reference_packed(x, h, delt, packed, hidden_length)
    assert jnp.allclose(h_next, ref_q, atol=2e-3, rtol=2e-3), "mismatch vs packed ref"

    # Loose semantic check vs the full-f32 unfused reference (bf16 quantization noise).
    ref = time_gru_reference(x, h, delt, params)
    assert jnp.allclose(h_next, ref, atol=5e-2, rtol=5e-2), "mismatch vs f32 reference"

    print("KERNEL_OK")
</pallas_src>

<mosaic_0001>
module attributes {stable_mosaic.version = 11 : i64} {
  func.func @_time_gru_kernel(%arg0: i32, %arg1: memref<8x16xbf16, #tpu.memory_space<vmem>>, %arg2: memref<8x128xf32, #tpu.memory_space<vmem>>, %arg3: memref<8x8xbf16, #tpu.memory_space<vmem>>, %arg4: memref<16x512xbf16, #tpu.memory_space<vmem>>, %arg5: memref<128x384xbf16, #tpu.memory_space<vmem>>, %arg6: memref<8x128xbf16, #tpu.memory_space<vmem>>, %arg7: memref<1x512xf32, #tpu.memory_space<vmem>>, %arg8: memref<8x128xf32, #tpu.memory_space<vmem>>) attributes {dimension_semantics = [#tpu.dimension_semantics<parallel>], iteration_bounds = array<i64: 2>, scalar_prefetch = 0 : i64, scratch_operands = 0 : i64, tpu.core_type = #tpu.core_type<tc>, window_params = [{transform_indices = @transform_0, window_bounds = array<i64: 8, 16>}, {transform_indices = @transform_1, window_bounds = array<i64: 8, 128>}, {transform_indices = @transform_2, window_bounds = array<i64: 8, 8>}, {pipeline_mode = #tpu.pipeline_mode<synchronous>, transform_indices = @transform_3, window_bounds = array<i64: 16, 512>}, {pipeline_mode = #tpu.pipeline_mode<synchronous>, transform_indices = @transform_4, window_bounds = array<i64: 128, 384>}, {pipeline_mode = #tpu.pipeline_mode<synchronous>, transform_indices = @transform_5, window_bounds = array<i64: 8, 128>}, {pipeline_mode = #tpu.pipeline_mode<synchronous>, transform_indices = @transform_6, window_bounds = array<i64: 1, 512>}, {transform_indices = @transform_7, window_bounds = array<i64: 8, 128>}]} {
    %c0 = arith.constant 0 : index
    %c0_0 = arith.constant 0 : index
    %0 = vector.load %arg1[%c0, %c0_0] : memref<8x16xbf16, #tpu.memory_space<vmem>>, vector<8x16xbf16>
    %c0_1 = arith.constant 0 : index
    %c0_2 = arith.constant 0 : index
    %1 = vector.load %arg2[%c0_1, %c0_2] : memref<8x128xf32, #tpu.memory_space<vmem>>, vector<8x128xf32>
    %c0_3 = arith.constant 0 : index
    %c0_4 = arith.constant 0 : index
    %2 = vector.load %arg3[%c0_3, %c0_4] : memref<8x8xbf16, #tpu.memory_space<vmem>>, vector<8x8xbf16>
    %c0_5 = arith.constant 0 : index
    %c0_6 = arith.constant 0 : index
    %3 = vector.load %arg4[%c0_5, %c0_6] : memref<16x512xbf16, #tpu.memory_space<vmem>>, vector<16x512xbf16>
    %cst = arith.constant dense<0.000000e+00> : vector<8x512xf32>
    %4 = tpu.matmul %0, %3, %cst {dimension_numbers = #tpu.dot_dimension_numbers<[1], [0], [0], [1], [0, 0, 1, 1], [], []>} : vector<8x16xbf16>, vector<16x512xbf16>, vector<8x512xf32> -> vector<8x512xf32>
    %c0_7 = arith.constant 0 : index
    %c0_8 = arith.constant 0 : index
    %5 = vector.load %arg7[%c0_7, %c0_8] : memref<1x512xf32, #tpu.memory_space<vmem>>, vector<1x512xf32>
    %6 = vector.broadcast %5 : vector<1x512xf32> to vector<8x512xf32>
    %7 = arith.addf %4, %6 : vector<8x512xf32>
    %8 = arith.truncf %1 : vector<8x128xf32> to vector<8x128xbf16>
    %c0_9 = arith.constant 0 : index
    %c0_10 = arith.constant 0 : index
    %9 = vector.load %arg5[%c0_9, %c0_10] : memref<128x384xbf16, #tpu.memory_space<vmem>>, vector<128x384xbf16>
    %cst_11 = arith.constant dense<0.000000e+00> : vector<8x384xf32>
    %10 = tpu.matmul %8, %9, %cst_11 {dimension_numbers = #tpu.dot_dimension_numbers<[1], [0], [0], [1], [0, 0, 1, 1], [], []>} : vector<8x128xbf16>, vector<128x384xbf16>, vector<8x384xf32> -> vector<8x384xf32>
    %c0_12 = arith.constant 0 : index
    %c0_13 = arith.constant 0 : index
    %11 = vector.load %arg6[%c0_12, %c0_13] : memref<8x128xbf16, #tpu.memory_space<vmem>>, vector<8x128xbf16>
    %cst_14 = arith.constant dense<0.000000e+00> : vector<8x128xf32>
    %12 = tpu.matmul %2, %11, %cst_14 {dimension_numbers = #tpu.dot_dimension_numbers<[1], [0], [0], [1], [0, 0, 1, 1], [], []>} : vector<8x8xbf16>, vector<8x128xbf16>, vector<8x128xf32> -> vector<8x128xf32>
    %13 = vector.extract_strided_slice %7 {offsets = [0, 0], sizes = [8, 128], strides = [1, 1]} : vector<8x512xf32> to vector<8x128xf32>
    %14 = vector.extract_strided_slice %10 {offsets = [0, 0], sizes = [8, 128], strides = [1, 1]} : vector<8x384xf32> to vector<8x128xf32>
    %15 = arith.addf %13, %14 : vector<8x128xf32>
    %16 = arith.negf %15 : vector<8x128xf32>
    %17 = math.exp %16 : vector<8x128xf32>
    %cst_15 = arith.constant 1.000000e+00 : f32
    %18 = vector.broadcast %cst_15 : f32 to vector<8x128xf32>
    %19 = arith.addf %18, %17 : vector<8x128xf32>
    %20 = arith.divf %18, %19 : vector<8x128xf32>
    %21 = vector.extract_strided_slice %7 {offsets = [0, 128], sizes = [8, 128], strides = [1, 1]} : vector<8x512xf32> to vector<8x128xf32>
    %22 = vector.extract_strided_slice %10 {offsets = [0, 128], sizes = [8, 128], strides = [1, 1]} : vector<8x384xf32> to vector<8x128xf32>
    %23 = arith.addf %21, %22 : vector<8x128xf32>
    %24 = arith.negf %23 : vector<8x128xf32>
    %25 = math.exp %24 : vector<8x128xf32>
    %cst_16 = arith.constant 1.000000e+00 : f32
    %26 = vector.broadcast %cst_16 : f32 to vector<8x128xf32>
    %27 = arith.addf %26, %25 : vector<8x128xf32>
    %28 = arith.divf %26, %27 : vector<8x128xf32>
    %29 = vector.extract_strided_slice %7 {offsets = [0, 384], sizes = [8, 128], strides = [1, 1]} : vector<8x512xf32> to vector<8x128xf32>
    %30 = arith.negf %12 : vector<8x128xf32>
    %31 = math.exp %30 : vector<8x128xf32>
    %cst_17 = arith.constant 1.000000e+00 : f32
    %32 = vector.broadcast %cst_17 : f32 to vector<8x128xf32>
    %33 = arith.addf %32, %31 : vector<8x128xf32>
    %34 = arith.divf %32, %33 : vector<8x128xf32>
    %35 = arith.addf %29, %34 : vector<8x128xf32>
    %36 = arith.negf %35 : vector<8x128xf32>
    %37 = math.exp %36 : vector<8x128xf32>
    %cst_18 = arith.constant 1.000000e+00 : f32
    %38 = vector.broadcast %cst_18 : f32 to vector<8x128xf32>
    %39 = arith.addf %38, %37 : vector<8x128xf32>
    %40 = arith.divf %38, %39 : vector<8x128xf32>
    %41 = vector.extract_strided_slice %7 {offsets = [0, 256], sizes = [8, 128], strides = [1, 1]} : vector<8x512xf32> to vector<8x128xf32>
    %42 = vector.extract_strided_slice %10 {offsets = [0, 256], sizes = [8, 128], strides = [1, 1]} : vector<8x384xf32> to vector<8x128xf32>
    %43 = arith.mulf %20, %42 : vector<8x128xf32>
    %44 = arith.addf %41, %43 : vector<8x128xf32>
    %45 = math.tanh %44 : vector<8x128xf32>
    %46 = arith.mulf %45, %40 : vector<8x128xf32>
    %47 = arith.subf %1, %46 : vector<8x128xf32>
    %48 = arith.mulf %28, %47 : vector<8x128xf32>
    %49 = arith.addf %46, %48 : vector<8x128xf32>
    %c0_19 = arith.constant 0 : index
    %c0_20 = arith.constant 0 : index
    %50 = vector.load %arg8[%c0_19, %c0_20] : memref<8x128xf32, #tpu.memory_space<vmem>>, vector<8x128xf32>
    tpu.vector_store %arg8[%c0_19, %c0_20], %49 {strides = array<i32>} : memref<8x128xf32, #tpu.memory_space<vmem>>, vector<8x128xf32>,
    return
  }
  func.func @transform_0(%arg0: i32) -> (i32, i32) {
    %c0_i32 = arith.constant 0 : i32
    %c0_i32_0 = arith.constant 0 : i32
    return %arg0, %c0_i32 : i32, i32
  }
  func.func @transform_1(%arg0: i32) -> (i32, i32) {
    %c0_i32 = arith.constant 0 : i32
    %c0_i32_0 = arith.constant 0 : i32
    return %arg0, %c0_i32 : i32, i32
  }
  func.func @transform_2(%arg0: i32) -> (i32, i32) {
    %c0_i32 = arith.constant 0 : i32
    %c0_i32_0 = arith.constant 0 : i32
    return %arg0, %c0_i32 : i32, i32
  }
  func.func @transform_3(%arg0: i32) -> (i32, i32) {
    %c0_i32 = arith.constant 0 : i32
    %c0_i32_0 = arith.constant 0 : i32
    %c0_i32_1 = arith.constant 0 : i32
    return %c0_i32, %c0_i32_0 : i32, i32
  }
  func.func @transform_4(%arg0: i32) -> (i32, i32) {
    %c0_i32 = arith.constant 0 : i32
    %c0_i32_0 = arith.constant 0 : i32
    %c0_i32_1 = arith.constant 0 : i32
    return %c0_i32, %c0_i32_0 : i32, i32
  }
  func.func @transform_5(%arg0: i32) -> (i32, i32) {
    %c0_i32 = arith.constant 0 : i32
    %c0_i32_0 = arith.constant 0 : i32
    %c0_i32_1 = arith.constant 0 : i32
    return %c0_i32, %c0_i32_0 : i32, i32
  }
  func.func @transform_6(%arg0: i32) -> (i32, i32) {
    %c0_i32 = arith.constant 0 : i32
    %c0_i32_0 = arith.constant 0 : i32
    %c0_i32_1 = arith.constant 0 : i32
    return %c0_i32, %c0_i32_0 : i32, i32
  }
  func.func @transform_7(%arg0: i32) -> (i32, i32) {
    %c0_i32 = arith.constant 0 : i32
    %c0_i32_0 = arith.constant 0 : i32
    return %arg0, %c0_i32 : i32, i32
  }
}

module attributes {stable_mosaic.version = 11 : i64} {
  func.func @_time_gru_kernel(%arg0: i32, %arg1: memref<8x16xbf16, #tpu.memory_space<vmem>>, %arg2: memref<8x128xf32, #tpu.memory_space<vmem>>, %arg3: memref<8x8xbf16, #tpu.memory_space<vmem>>, %arg4: memref<16x512xbf16, #tpu.memory_space<vmem>>, %arg5: memref<128x384xbf16, #tpu.memory_space<vmem>>, %arg6: memref<8x128xbf16, #tpu.memory_space<vmem>>, %arg7: memref<1x512xf32, #tpu.memory_space<vmem>>, %arg8: memref<8x128xf32, #tpu.memory_space<vmem>>) attributes {dimension_semantics = [#tpu.dimension_semantics<parallel>], iteration_bounds = array<i64: 2>, scalar_prefetch = 0 : i64, scratch_operands = 0 : i64, tpu.core_type = #tpu.core_type<tc>, window_params = [{transform_indices = @transform_0, window_bounds = array<i64: 8, 16>}, {transform_indices = @transform_1, window_bounds = array<i64: 8, 128>}, {transform_indices = @transform_2, window_bounds = array<i64: 8, 8>}, {pipeline_mode = #tpu.pipeline_mode<synchronous>, transform_indices = @transform_3, window_bounds = array<i64: 16, 512>}, {pipeline_mode = #tpu.pipeline_mode<synchronous>, transform_indices = @transform_4, window_bounds = array<i64: 128, 384>}, {pipeline_mode = #tpu.pipeline_mode<synchronous>, transform_indices = @transform_5, window_bounds = array<i64: 8, 128>}, {pipeline_mode = #tpu.pipeline_mode<synchronous>, transform_indices = @transform_6, window_bounds = array<i64: 1, 512>}, {transform_indices = @transform_7, window_bounds = array<i64: 8, 128>}]} {
    %c0 = arith.constant 0 : index
    %c0_0 = arith.constant 0 : index
    %0 = vector.load %arg1[%c0, %c0_0] : memref<8x16xbf16, #tpu.memory_space<vmem>>, vector<8x16xbf16>
    %c0_1 = arith.constant 0 : index
    %c0_2 = arith.constant 0 : index
    %1 = vector.load %arg2[%c0_1, %c0_2] : memref<8x128xf32, #tpu.memory_space<vmem>>, vector<8x128xf32>
    %c0_3 = arith.constant 0 : index
    %c0_4 = arith.constant 0 : index
    %2 = vector.load %arg3[%c0_3, %c0_4] : memref<8x8xbf16, #tpu.memory_space<vmem>>, vector<8x8xbf16>
    %c0_5 = arith.constant 0 : index
    %c0_6 = arith.constant 0 : index
    %3 = vector.load %arg4[%c0_5, %c0_6] : memref<16x512xbf16, #tpu.memory_space<vmem>>, vector<16x512xbf16>
    %cst = arith.constant dense<0.000000e+00> : vector<8x512xf32>
    %4 = tpu.matmul %0, %3, %cst {dimension_numbers = #tpu.dot_dimension_numbers<[1], [0], [0], [1], [0, 0, 1, 1], [], []>} : vector<8x16xbf16>, vector<16x512xbf16>, vector<8x512xf32> -> vector<8x512xf32>
    %c0_7 = arith.constant 0 : index
    %c0_8 = arith.constant 0 : index
    %5 = vector.load %arg7[%c0_7, %c0_8] : memref<1x512xf32, #tpu.memory_space<vmem>>, vector<1x512xf32>
    %6 = vector.broadcast %5 : vector<1x512xf32> to vector<8x512xf32>
    %7 = arith.addf %4, %6 : vector<8x512xf32>
    %8 = arith.truncf %1 : vector<8x128xf32> to vector<8x128xbf16>
    %c0_9 = arith.constant 0 : index
    %c0_10 = arith.constant 0 : index
    %9 = vector.load %arg5[%c0_9, %c0_10] : memref<128x384xbf16, #tpu.memory_space<vmem>>, vector<128x384xbf16>
    %cst_11 = arith.constant dense<0.000000e+00> : vector<8x384xf32>
    %10 = tpu.matmul %8, %9, %cst_11 {dimension_numbers = #tpu.dot_dimension_numbers<[1], [0], [0], [1], [0, 0, 1, 1], [], []>} : vector<8x128xbf16>, vector<128x384xbf16>, vector<8x384xf32> -> vector<8x384xf32>
    %c0_12 = arith.constant 0 : index
    %c0_13 = arith.constant 0 : index
    %11 = vector.load %arg6[%c0_12, %c0_13] : memref<8x128xbf16, #tpu.memory_space<vmem>>, vector<8x128xbf16>
    %cst_14 = arith.constant dense<0.000000e+00> : vector<8x128xf32>
    %12 = tpu.matmul %2, %11, %cst_14 {dimension_numbers = #tpu.dot_dimension_numbers<[1], [0], [0], [1], [0, 0, 1, 1], [], []>} : vector<8x8xbf16>, vector<8x128xbf16>, vector<8x128xf32> -> vector<8x128xf32>
    %13 = vector.extract_strided_slice %7 {offsets = [0, 0], sizes = [8, 128], strides = [1, 1]} : vector<8x512xf32> to vector<8x128xf32>
    %14 = vector.extract_strided_slice %10 {offsets = [0, 0], sizes = [8, 128], strides = [1, 1]} : vector<8x384xf32> to vector<8x128xf32>
    %15 = arith.addf %13, %14 : vector<8x128xf32>
    %16 = arith.negf %15 : vector<8x128xf32>
    %17 = math.exp %16 : vector<8x128xf32>
    %cst_15 = arith.constant 1.000000e+00 : f32
    %18 = vector.broadcast %cst_15 : f32 to vector<8x128xf32>
    %19 = arith.addf %18, %17 : vector<8x128xf32>
    %20 = arith.divf %18, %19 : vector<8x128xf32>
    %21 = vector.extract_strided_slice %7 {offsets = [0, 128], sizes = [8, 128], strides = [1, 1]} : vector<8x512xf32> to vector<8x128xf32>
    %22 = vector.extract_strided_slice %10 {offsets = [0, 128], sizes = [8, 128], strides = [1, 1]} : vector<8x384xf32> to vector<8x128xf32>
    %23 = arith.addf %21, %22 : vector<8x128xf32>
    %24 = arith.negf %23 : vector<8x128xf32>
    %25 = math.exp %24 : vector<8x128xf32>
    %cst_16 = arith.constant 1.000000e+00 : f32
    %26 = vector.broadcast %cst_16 : f32 to vector<8x128xf32>
    %27 = arith.addf %26, %25 : vector<8x128xf32>
    %28 = arith.divf %26, %27 : vector<8x128xf32>
    %29 = vector.extract_strided_slice %7 {offsets = [0, 384], sizes = [8, 128], strides = [1, 1]} : vector<8x512xf32> to vector<8x128xf32>
    %30 = arith.negf %12 : vector<8x128xf32>
    %31 = math.exp %30 : vector<8x128xf32>
    %cst_17 = arith.constant 1.000000e+00 : f32
    %32 = vector.broadcast %cst_17 : f32 to vector<8x128xf32>
    %33 = arith.addf %32, %31 : vector<8x128xf32>
    %34 = arith.divf %32, %33 : vector<8x128xf32>
    %35 = arith.addf %29, %34 : vector<8x128xf32>
    %36 = arith.negf %35 : vector<8x128xf32>
    %37 = math.exp %36 : vector<8x128xf32>
    %cst_18 = arith.constant 1.000000e+00 : f32
    %38 = vector.broadcast %cst_18 : f32 to vector<8x128xf32>
    %39 = arith.addf %38, %37 : vector<8x128xf32>
    %40 = arith.divf %38, %39 : vector<8x128xf32>
    %41 = vector.extract_strided_slice %7 {offsets = [0, 256], sizes = [8, 128], strides = [1, 1]} : vector<8x512xf32> to vector<8x128xf32>
    %42 = vector.extract_strided_slice %10 {offsets = [0, 256], sizes = [8, 128], strides = [1, 1]} : vector<8x384xf32> to vector<8x128xf32>
    %43 = arith.mulf %20, %42 : vector<8x128xf32>
    %44 = arith.addf %41, %43 : vector<8x128xf32>
    %45 = math.tanh %44 : vector<8x128xf32>
    %46 = arith.mulf %45, %40 : vector<8x128xf32>
    %47 = arith.subf %1, %46 : vector<8x128xf32>
    %48 = arith.mulf %28, %47 : vector<8x128xf32>
    %49 = arith.addf %46, %48 : vector<8x128xf32>
    %c0_19 = arith.constant 0 : index
    %c0_20 = arith.constant 0 : index
    %50 = vector.load %arg8[%c0_19, %c0_20] : memref<8x128xf32, #tpu.memory_space<vmem>>, vector<8x128xf32>
    tpu.vector_store %arg8[%c0_19, %c0_20], %49 {strides = array<i32>} : memref<8x128xf32, #tpu.memory_space<vmem>>, vector<8x128xf32>,
    return
  }
  func.func @transform_0(%arg0: i32) -> (i32, i32) {
    %c0_i32 = arith.constant 0 : i32
    %c0_i32_0 = arith.constant 0 : i32
    return %arg0, %c0_i32 : i32, i32
  }
  func.func @transform_1(%arg0: i32) -> (i32, i32) {
    %c0_i32 = arith.constant 0 : i32
    %c0_i32_0 = arith.constant 0 : i32
    return %arg0, %c0_i32 : i32, i32
  }
  func.func @transform_2(%arg0: i32) -> (i32, i32) {
    %c0_i32 = arith.constant 0 : i32
    %c0_i32_0 = arith.constant 0 : i32
    return %arg0, %c0_i32 : i32, i32
  }
  func.func @transform_3(%arg0: i32) -> (i32, i32) {
    %c0_i32 = arith.constant 0 : i32
    %c0_i32_0 = arith.constant 0 : i32
    %c0_i32_1 = arith.constant 0 : i32
    return %c0_i32, %c0_i32_0 : i32, i32
  }
  func.func @transform_4(%arg0: i32) -> (i32, i32) {
    %c0_i32 = arith.constant 0 : i32
    %c0_i32_0 = arith.constant 0 : i32
    %c0_i32_1 = arith.constant 0 : i32
    return %c0_i32, %c0_i32_0 : i32, i32
  }
  func.func @transform_5(%arg0: i32) -> (i32, i32) {
    %c0_i32 = arith.constant 0 : i32
    %c0_i32_0 = arith.constant 0 : i32
    %c0_i32_1 = arith.constant 0 : i32
    return %c0_i32, %c0_i32_0 : i32, i32
  }
  func.func @transform_6(%arg0: i32) -> (i32, i32) {
    %c0_i32 = arith.constant 0 : i32
    %c0_i32_0 = arith.constant 0 : i32
    %c0_i32_1 = arith.constant 0 : i32
    return %c0_i32, %c0_i32_0 : i32, i32
  }
  func.func @transform_7(%arg0: i32) -> (i32, i32) {
    %c0_i32 = arith.constant 0 : i32
    %c0_i32_0 = arith.constant 0 : i32
    return %arg0, %c0_i32 : i32, i32
  }
}

</mosaic_0001>

<bundles_post_ra>
// kernel: tpu_custom_call.1
= control target key start
LH: loop header
LB: loop body
LE: loop exit
PB: predicated region body
PF: predicated region fallthrough
CT: control target
= control target key end

     0   :  { %s1569_s0 = inlined_call_operand.vmem [shape: bf16[16,16], index: 0, kind: input, shape index: {}]   ;;  %s1570_s1 = inlined_call_operand.hbm [shape: f32[16,128], index: 1, kind: input, shape index: {}]   ;;  %s1571_s2 = inlined_call_operand.vmem [shape: bf16[16,8], index: 2, kind: input, shape index: {}]   ;;  %s1572_s3 = inlined_call_operand.hbm [shape: bf16[16,512], index: 3, kind: input, shape index: {}]   ;;  %s1573_s4 = inlined_call_operand.hbm [shape: bf16[128,384], index: 4, kind: input, shape index: {}]   ;;  %s1574_s5 = inlined_call_operand.vmem [shape: bf16[8,128], index: 5, kind: input, shape index: {}]   ;;  %s1575_s6 = inlined_call_operand.vmem [shape: f32[1,512], index: 6, kind: input, shape index: {}]   ;;  %s1576_s7 = inlined_call_operand.hbm [shape: f32[16,128], index: 7, kind: output, shape index: {}]  }
   0x1   :  { %1581 = sst [smem:[#allocation12_spill]] %s1572_s3 }
   0x2   :  { %1582 = sst [smem:[#allocation13_spill]] %s1573_s4 }
   0x3   :  { %12 = vsyncpa [#allocation3], 0 }
   0x4   :  { %14 = vsyncpa [#allocation3 + $0x1], 0 }
   0x5   :  { %15 = vsyncpa [#allocation6], 0 }
   0x6   :  { %16 = vsyncpa [#allocation4], 0 }
   0x7   :  { %18 = vsyncpa [#allocation4 + $0x1], 0  ;;  %s1367_s24 = smov 0   ;;  %s1369_s25 = smov 0  }
   0x8   :  { %s1371_s26 = smov 0   ;;  %s1373_s27 = smov 0  }
   0x9 LB: > { %s1388_s28 = sadd.s32 4294967295, %s1314_s27   ;;  %s946_s29 = sadd.s32 4294967294, %s1314_s27   ;;  %s1314_s27 = sphi %s1373_s27, %s1602_s27   ;;  %s1310_s26 = sphi %s1371_s26, %s1601_s26   ;;  %s1306_s25 = sphi %s1369_s25, %s1600_s25   ;;  %s1302_s24 = sphi %s1367_s24, %s1599_s24  }
   0xa   : > { %p70_p0 = scmp.ne.s32.totalorder %s1306_s25, %s1302_s24  ;;  %p1577_p1 = scmp.eq.s32.totalorder %s1388_s28, 0 }
   0xb   : > { %p210_p3 = scmp.eq.s32.totalorder %s946_s29, 1  ;;  %p947_p5 = scmp.ge.s32.totalorder %s1314_s27, 1 }
   0xc   : > { %p1397_p4 = por %p1577_p1, %p70_p0  ;;  %p217_p7 = scmp.lt.s32.totalorder %s1314_s27, 3 }
   0xd   : > { %p1402_p6 = por %p210_p3, %p70_p0  ;;  %s1316_s10 = smov [#allocation5]  }
   0xe   : > { %s1583_s30 = scalar_select %p1397_p4, 1, 0 }
   0xf   : > { %s1584_s8 = scalar_select %p1402_p6, 1, 0 }
  0x10   : > { %p1407_p8 = pnand %p947_p5, %p217_p7  ;;  %s229_s11 = sshll.u32 %s1316_s10, 4  ;;  %s230_s11 = int_to_ptr.vmem [resolvable:$true] %s229_s11 }
  0x11   : > { %s1317_s13 = smov [#allocation7]   ;;  %s1177_s15 = scalar_lea.vmem %s230_s11, 512 }
  0x12   : > { %s1585_s9 = scalar_select %p1407_p8, 1, 0 }
  0x13   : > { %p1048_p9 = pneg %p1407_p8  ;;  %s242_s14 = sshll.u32 %s1317_s13, 4  ;;  %s243_s14 = int_to_ptr.vmem [resolvable:$true] %s242_s14 }
  0x14   : > { %p1178_p13 = scmp.ne.s32.totalorder %s230_s11, %s1177_s15  ;;  %p1185_p5 = scmp.lt.s32.totalorder %s230_s11, %s230_s11 }
  0x15   : > { %p1416_p11 = pnand %p1048_p9, %p1577_p1  ;;  %p1186_p7 = scmp.lt.s32.totalorder %s1177_s15, %s1177_s15 }
  0x17   : > { %p1168_p12 = pneg %p1416_p11  ;;  %p1187_p10 = por %p1186_p7, %p1185_p5 }
  0x19   : > { %p1180_p0 = pnand %p1178_p13, %p1168_p12 }
  0x1b   : > { %p1181_p3 = pneg %p1180_p0 }
  0x1d   : > { %p1188_p9 = pnand %p1187_p10, %p1181_p3 }
  0x1f   : > { %1191 = shalt.err (!%p1188_p9)
}
  0x20   : > { %s1318_s16 = smov 256   ;;  %s1319_s17 = smov 16  }
  0x21   : > { %s1587_s3 = sld [smem:[#allocation12_spill]]  ;;  %s1203_s20 = scalar_lea.vmem %s243_s14, 3072 }
  0x22   : > { %p1204_p1 = scmp.ne.s32.totalorder %s243_s14, %s1203_s20  ;;  %p1211_p2 = scmp.lt.s32.totalorder %s243_s14, %s243_s14 }
  0x23   : > { %p1212_p6 = scmp.lt.s32.totalorder %s1203_s20, %s1203_s20 }
  0x24   : > { %p1206_p13 = pnand %p1204_p1, %p1168_p12 }
  0x25   : > { %p1213_p5 = por %p1212_p6, %p1211_p2 }
  0x26   : > { %p1207_p0 = pneg %p1206_p13 }
  0x27   : > { %1051 = dma.hbm_to_vmem [thread:$0]  (!%p1416_p11), %s1587_s3, 512, %s230_s11, [#allocation6], %s1318_s16, %s1318_s16, %s1319_s17  }
  0x28   : > { %p1214_p10 = pnand %p1213_p5, %p1207_p0 }
  0x2a   : > { %1217 = shalt.err (!%p1214_p10)
}
  0x2b   : > { %s1320_s21 = smov 192   ;;  %s1321_s22 = smov 12  }
  0x2c   : > { %s1588_s4 = sld [smem:[#allocation13_spill]]  ;;  %s1439_s10 = sadd.s32 1, %s1314_s27  }
  0x2d   : > { %s54_s11 = ssub.s32 %s1314_s27, %s1439_s10  ;;  %s57_s13 = sadd.s32 1, %s1310_s26 }
  0x2e   : > { %p55_p1 = scmp.eq.s32.totalorder %s54_s11, 0  ;;  %p64_p2 = scmp.ne.s32.totalorder %s1310_s26, %s1306_s25 }
  0x2f   : > { %p65_p6 = scmp.eq.s32.totalorder %s1314_s27, 0  ;;  %p1589_p3 = scmp.eq.s32.totalorder %s1388_s28, 1 }
  0x30   : > { %s1448_s15 = scalar_select %p55_p1, %s1310_s26, %s57_s13  }
  0x31   : > { %p66_p12 = por %p65_p6, %p64_p2  ;;  %p1452_p7 = por %p1589_p3, %p64_p2 }
  0x32   : > { %1054 = dma.hbm_to_vmem [thread:$0]  (!%p1416_p11), %s1588_s4, 3072, %s243_s14, [#allocation6], %s1320_s21, %s1320_s21, %s1321_s22  }
  0x33   : > { %s1590_s16 = scalar_select %p1452_p7, 1, 0 }
  0x34   : > { %p1065_p9 = scmp.lt.s32.totalorder %s1314_s27, 2  ;;  %s269_s12 = sand.u32 1, %s1310_s26  }
  0x35   : > { %s951_s17 = sshll.u32 %s269_s12, 3  ;;  %s952_s14 = sshll.u32 %s1314_s27, 7 }
  0x36   : > { %s1462_s20 = scalar_lea.hbm %s1570_s1, %s952_s14  ;;  %s273_s21 = scalar_lea.vmem [#allocation2], %s951_s17 }
  0x37   : > { %s280_s22 = sshll.u32 %s273_s21, 4  ;;  %p1464_p11 = pnand %p1065_p9, %p66_p12  ;;  %s281_s22 = int_to_ptr.vmem [resolvable:$true] %s280_s22 }
  0x38   : > { %s270_s29 = scalar_lea.sflag [#allocation3], %s269_s12  ;;  %s1218_s11 = scalar_lea.hbm %s1462_s20, 128 }
  0x39   : > { %p1219_p13 = scmp.ne.s32.totalorder %s1462_s20, %s1218_s11  ;;  %p1220_p0 = pneg %p1464_p11 }
  0x3a   : > { %s1223_s18 = scalar_lea.hbm %s1570_s1, 256  ;;  %p1224_p1 = scmp.lt.s32.totalorder %s1462_s20, %s1570_s1 }
  0x3b   : > { %p1221_p5 = pnand %p1220_p0, %p1219_p13  ;;  %p1225_p2 = scmp.lt.s32.totalorder %s1223_s18, %s1218_s11 }
  0x3d   : > { %p1222_p10 = pneg %p1221_p5  ;;  %p1226_p6 = por %p1225_p2, %p1224_p1 }
  0x3f   : > { %p1227_p12 = pnand %p1226_p6, %p1222_p10 }
  0x41   : > { %1230 = shalt.err (!%p1227_p12)
}
  0x42   : > { %s1231_s21 = scalar_lea.vmem %s281_s22, 128  ;;  %s1322_s12 = smov [#allocation2]  }
  0x43   : > { %p1232_p3 = scmp.ne.s32.totalorder %s281_s22, %s1231_s21  ;;  %s1236_s3 = sshll.u32 %s1322_s12, 4  ;;  %s1237_s3 = int_to_ptr.vmem [resolvable:$false] %s1236_s3 }
  0x44   : > { %s1238_s4 = scalar_lea.vmem %s1237_s3, 256  ;;  %p1239_p13 = scmp.lt.s32.totalorder %s281_s22, %s1237_s3 }
  0x45   : > { %p1234_p9 = pnand %p1232_p3, %p1220_p0  ;;  %p1240_p5 = scmp.lt.s32.totalorder %s1238_s4, %s1231_s21 }
  0x47   : > { %p1235_p7 = pneg %p1234_p9  ;;  %p1241_p4 = por %p1240_p5, %p1239_p13 }
  0x49   : > { %p1242_p8 = pnand %p1241_p4, %p1235_p7 }
  0x4b   : > { %1245 = shalt.err (!%p1242_p8)
}
  0x4c   : > { %1058 = dma.hbm_to_vmem [thread:$0]  (!%p1464_p11), %s1462_s20, 128, %s281_s22, %s270_s29  }
  0x4d   : > { %p1592_p10 = scmp.ne.s32.totalorder %s1585_s9, 0 }
  0x4e   : > { %s1485_s11 = sand.u32 (!%p1592_p10), 1, %s1306_s25   ;;  %p1593_p4 = scmp.ne.s32.totalorder (!%p1592_p10), %s1583_s30, 0 }
  0x4f   : > { %296 = sbr.rel (%p1592_p10) target bundleno = 415 (0x19f), region = 48  ;;  %s954_s13 = sshll.u32 (!%p1592_p10), %s1485_s11, 3 }
  0x50   : > { %s299_s3 = scalar_lea.sflag (!%p1592_p10), [#allocation3], %s1485_s11  ;;  %s1491_s4 = scalar_lea.vmem (!%p1592_p10), [#allocation2], %s954_s13 }
  0x54   : > { %1289 = dma.done.wait (%p1593_p4), %s299_s3, 128  }
  0x55   : > { %1291 = vsyncadd (%p1593_p4), %s299_s3, 4294967168  ;;  %p1594_p8 = scmp.eq.s32.totalorder %s1388_s28, 0 }
  0x57   : > { %1293 = dma.done.wait (%p1594_p8), [#allocation6], 3584   ;;  %p1595_p7 = pmov %p1594_p8 }
  0x58   : > { %p349_p11 = scmp.lt.s32.totalorder %s1388_s28, 1  ;;  %v1323_v0 = vmov 0   ;;  %v1110_v1 = vld [vmem:[#allocation5 + $0x4] ss:$16 sps:$4 sm:$0xff]   ;;  %v1112_v2 = vld [vmem:[#allocation5] ss:$16 sps:$4 sm:$0xff]   ;;  %v367_v44 = vlaneseq }
  0x59   : > { %1295 = vsyncadd (%p1595_p7), [#allocation6], 4294963712  ;;  %443 = vmatprep.mubr.bf16.mxu0 %v1323_v0  ;;  %484 = vmatprep.mubr.bf16.mxu1 %v1323_v0  ;;  %v1115_v4 = vld [vmem:[#allocation7 + $0xac] ss:$12 sps:$4 sm:$0xff]   ;;  %vm407_vm0 = vcmask 130048   ;;  %v1324_v16 = vmov 0.0  }
  0x5a   : > { %s1503_s9 = scalar_select %p349_p11, %s1388_s28, 1  ;;  %425 = vmatprep.subr.bf16.mxu0 %v1110_v1  ;;  %v1113_v5 = vld [vmem:[#allocation7 + $0xa8] ss:$12 sps:$4 sm:$0xff]   ;;  %v1116_v7 = vld [vmem:[#allocation7 + $0x90] ss:$12 sps:$4 sm:$0xff]   ;;  %vm1325_vm1 = vmmov 0  }
  0x5b   : > { %426 = vmatpush1.bf16.msra.mxu0 %v1112_v2  ;;  %v1118_v6 = vld [vmem:[#allocation7 + $0x94] ss:$12 sps:$4 sm:$0xff]   ;;  %v1121_v8 = vld [vmem:[#allocation7 + $0x7c] ss:$12 sps:$4 sm:$0xff]   ;;  %v1119_v9 = vld [vmem:[#allocation7 + $0x78] ss:$12 sps:$4 sm:$0xff]  }
  0x5c   : > { %s958_s20 = sshll.u32 %s1503_s9, 2  ;;  %654 = vmatprep.subr.bf16.mxu0 %v1115_v4  ;;  %v1124_v10 = vld [vmem:[#allocation7 + $0x64] ss:$12 sps:$4 sm:$0xff]   ;;  %v1137_v11 = vld [vmem:[#allocation5 + $0xc] ss:$16 sps:$4 sm:$0xff]   ;;  %vm740_vm2 = vcmask 1043456  }
  0x5d   : > { %s352_s23 = scalar_lea.vmem %s1569_s0, %s958_s20  ;;  %v1139_v12 = vld [vmem:[#allocation5 + $0x8] ss:$16 sps:$4 sm:$0xff]   ;;  %v1122_v13 = vld [vmem:[#allocation7 + $0x60] ss:$12 sps:$4 sm:$0xff]   ;;  %466 = vmatprep.subr.bf16.mxu1 %v1137_v11  ;;  %v1140_v15 = vld [vmem:[#allocation7 + $0xb0] ss:$12 sps:$4 sm:$0xff]   ;;  %s356_s17 = scalar_lea.vmem %s1571_s2, %s958_s20 }
  0x5e   : > { %v358_v3 = vld [vmem:[%s352_s23] sm:$0xf]  ;;  %v1127_v14 = vld [vmem:[#allocation7 + $0x4c] ss:$12 sps:$4 sm:$0xff]   ;;  %467 = vmatpush1.bf16.msra.mxu1 %v1139_v12  ;;  %v1125_v17 = vld [vmem:[#allocation7 + $0x48] ss:$12 sps:$4 sm:$0xff]  }
  0x5f   : > { %964 = vmatmul.mubr.msk.bf16.vlgmr.msra.gmra.mxu0 %vm407_vm0, %v358_v3  ;;  %1010 = vmatprep.subr.bf16.mxu1 %v1324_v16  ;;  %v1130_v18 = vld [vmem:[#allocation7 + $0x34] ss:$12 sps:$4 sm:$0xff]   ;;  %v1141_v19 = vld [vmem:[#allocation7 + $0x98] ss:$12 sps:$4 sm:$0xff]   ;;  %v1128_v20 = vld [vmem:[#allocation7 + $0x30] ss:$12 sps:$4 sm:$0xff]  }
  0x60   : > { %655 = vmatpush1.bf16.msra.mxu0 %v1113_v5  ;;  %686 = vmatprep.mubr.bf16.mxu0 %v1323_v0  ;;  %v1133_v21 = vld [vmem:[#allocation7 + $0x1c] ss:$12 sps:$4 sm:$0xff]   ;;  %v1142_v22 = vld [vmem:[#allocation7 + $0x80] ss:$12 sps:$4 sm:$0xff]   ;;  %v1131_v23 = vld [vmem:[#allocation7 + $0x18] ss:$12 sps:$4 sm:$0xff]  }
  0x61   : > { %656 = vmatprep.subr.bf16.mxu0 %v1118_v6  ;;  %965 = vmatmul.mubr.msk.bf16.vlgmr.msra.gmra.mxu1 %vm407_vm0, %v358_v3  ;;  %v1136_v24 = vld [vmem:[#allocation7 + $0x4] ss:$12 sps:$4 sm:$0xff]   ;;  %v1143_v25 = vld [vmem:[#allocation7 + $0x68] ss:$12 sps:$4 sm:$0xff]   ;;  %v1134_v26 = vld [vmem:[#allocation7] ss:$12 sps:$4 sm:$0xff]  }
  0x62   : > { %1011 = vmatpush3.bf16.msra.mxu1 %v1140_v15  ;;  %1026 = vmatprep.mubr.msk.bf16.mxu1 %vm1325_vm1, %v1324_v16  ;;  %v1515_v27 = vld [vmem:[%s1491_s4] sm:$0xff]  ;;  %v1146_v33 = vld [vmem:[#allocation7 + $0x20] ss:$12 sps:$4 sm:$0xff]   ;;  %vm736_vm3 = vcmask 64512   ;;  %v368_v45 = vshrl.u32 %v367_v44, 7  ;;  %s996_s3 = sshll.u32 %s1388_s28, 7 }
  0x63   : > { %1012 = vmatprep.subr.bf16.mxu1 %v1324_v16  ;;  %v1144_v28 = vld [vmem:[#allocation7 + $0x50] ss:$12 sps:$4 sm:$0xff]   ;;  %v493_v30 = vpack.c.bf16 %v1515_v27, %v1515_v27  ;;  %v1145_v32 = vld [vmem:[#allocation7 + $0x38] ss:$12 sps:$4 sm:$0xff]   ;;  %v1147_v35 = vld [vmem:[#allocation7 + $0x8] ss:$12 sps:$4 sm:$0xff]   ;;  %s831_s22 = scalar_lea.hbm %s1576_s7, %s996_s3 }
  0x64   : > { %657 = vmatpush1.bf16.msra.mxu0 %v1116_v7  ;;  %v735_v29 = vld [vmem:[%s1574_s5] sm:$0xf]  ;;  %v369_v46 = vsub.s32 0, %v368_v45  ;;  %v373_v3 = vsub.s32 1, %v368_v45  ;;  %v381_v6 = vsub.s32 3, %v368_v45  ;;  %s348_s4 = scalar_lea.vmem [#allocation8], %s954_s13 }
  0x65   : > { %658 = vmatprep.subr.bf16.mxu0 %v1121_v8  ;;  %v742_v31 = vsel %vm740_vm2, %v735_v29, 0  ;;  %v360_v34 = vld [vmem:[%s356_s17] sm:$0xf]  ;;  %s833_s9 = sshll.u32 %s348_s4, 4  ;;  %s820_s23 = scalar_lea.sflag [#allocation4], %s1485_s11  ;;  %s834_s9 = int_to_ptr.vmem [resolvable:$true] %s833_s9 }
  0x66   : > { %1013 = vmatpush3.bf16.msra.mxu1 %v1141_v19  ;;  %v365_v47 = vld [vmem:[%s1575_s6] sm:$0xf]  ;;  %s1246_s29 = scalar_lea.vmem %s834_s9, 128  ;;  %p1596_p1 = scmp.ne.s32.totalorder %s1590_s16, 0 }
  0x67   : > { %1014 = vmatprep.subr.bf16.mxu1 %v1324_v16  ;;  %v370_v49 = vrot.slane %v365_v47, %v369_v46  ;;  %v374_v5 = vrot.slane %v365_v47, %v373_v3  ;;  %p1247_p0 = scmp.ne.s32.totalorder %s834_s9, %s1246_s29  ;;  %s1326_s14 = smov [#allocation8]  }
  0x68   : > { %659 = vmatpush1.bf16.msra.mxu0 %v1119_v9  ;;  %v382_v9 = vrot.slane %v365_v47, %v381_v6  ;;  %s1250_s18 = sshll.u32 %s1326_s14, 4  ;;  %s1251_s18 = int_to_ptr.vmem [resolvable:$false] %s1250_s18 }
  0x69   : > { %660 = vmatprep.subr.bf16.mxu0 %v1124_v10  ;;  %p1248_p2 = pnand %p1247_p0, %p1596_p1  ;;  %s1252_s28 = scalar_lea.vmem %s1251_s18, 256 }
  0x6a   : > { %1015 = vmatpush3.bf16.msra.mxu1 %v1142_v22  ;;  %p1253_p12 = scmp.lt.s32.totalorder %s834_s9, %s1251_s18  ;;  %p1254_p3 = scmp.lt.s32.totalorder %s1252_s28, %s1246_s29 }
  0x6b   : > { %1016 = vmatprep.subr.bf16.mxu1 %v1324_v16  ;;  %p1249_p6 = pneg %p1248_p2 }
  0x6c   : > { %661 = vmatpush1.bf16.msra.mxu0 %v1122_v13  ;;  %p1255_p9 = por %p1254_p3, %p1253_p12 }
  0x6d   : > { %662 = vmatprep.subr.bf16.mxu0 %v1127_v14 }
  0x6e   : > { %1017 = vmatpush3.bf16.msra.mxu1 %v1143_v25  ;;  %p1256_p13 = pnand %p1255_p9, %p1249_p6 }
  0x6f   : > { %1018 = vmatprep.subr.bf16.mxu1 %v1324_v16 }
  0x70   : > { %663 = vmatpush1.bf16.msra.mxu0 %v1125_v17 }
  0x71   : > { %664 = vmatprep.subr.bf16.mxu0 %v1130_v18 }
  0x72   : > { %1019 = vmatpush3.bf16.msra.mxu1 %v1144_v28 }
  0x73   : > { %1020 = vmatprep.subr.bf16.mxu1 %v1324_v16 }
  0x74   : > { %665 = vmatpush1.bf16.msra.mxu0 %v1128_v20 }
  0x75   : > { %666 = vmatprep.subr.bf16.mxu0 %v1133_v21 }
  0x76   : > { %1021 = vmatpush3.bf16.msra.mxu1 %v1145_v32 }
  0x77   : > { %1022 = vmatprep.subr.bf16.mxu1 %v1324_v16 }
  0x78   : > { %667 = vmatpush1.bf16.msra.mxu0 %v1131_v23 }
  0x79   : > { %668 = vmatprep.subr.bf16.mxu0 %v1136_v24 }
  0x7a   : > { %1023 = vmatpush3.bf16.msra.mxu1 %v1146_v33 }
  0x7b   : > { %1024 = vmatprep.subr.bf16.mxu1 %v1324_v16 }
  0x7c   : > { %669 = vmatpush1.bf16.msra.mxu0 %v1134_v26 }
  0x7d   : > { %1030 = vmatprep.subr.bf16.mxu0 %v1324_v16 }
  0x7e   : > { %1025 = vmatpush3.bf16.msra.mxu1 %v1147_v35 }
  0x7f   : > { %687 = vmatmul.mubr.bf16.vlgmr.msra.gmra.mxu0 %v493_v30 }
  0x80   : > { %1031 = vmatpush3.bf16.msra.mxu0 %v742_v31  ;;  %1032 = vmatprep.mubr.msk.bf16.mxu0 %vm1325_vm1, %v1324_v16  ;;  %v377_v16 = vsub.s32 2, %v368_v45 }
  0x81   : > { %1027 = vmatmul.mubr.bf16.vlgmr.msra.gmra.mxu1 %v493_v30 }
  0x82   : > { %v378_v18 = vrot.slane %v365_v47, %v377_v16 }
  0x87   : > { %1033 = vmatmul.mubr.msk.bf16.vlgmr.msra.gmra.mxu0 %vm736_vm3, %v360_v34 }
 0x11f   : > { %v445_v36 = vpop.f32.mrf.mxu0 }
 0x120   : > { %v446_v52 = vadd.f32 %v445_v36, %v370_v49 }
 0x121   : > { %v447_v37 = vpop.f32.mrf.mxu0  ;;  %v486_v40 = vpop.f32.mrf.mxu1 }
 0x122   : > { %v448_v8 = vadd.f32 %v447_v37, %v374_v5  ;;  %v487_v20 = vadd.f32 %v486_v40, %v378_v18 }
 0x123   : > { %v449_v38 = vpop.f32.mrf.mxu0  ;;  %v488_v41 = vpop.f32.mrf.mxu1 }
 0x124   : > { %v489_v11 = vadd.f32 %v488_v41, %v382_v9 }
 0x125   : > { %v450_v39 = vpop.f32.mrf.mxu0  ;;  %v490_v42 = vpop.f32.mrf.mxu1 }
 0x127   : > { %v491_v43 = vpop.f32.mrf.mxu1 }
 0x13f   : > { %v688_v48 = vpop.f32.mrf.mxu0 }
 0x140   : > { %v784_v54 = vadd.f32 %v688_v48, %v446_v52 }
 0x141   : > { %v690_v50 = vpop.f32.mrf.mxu0  ;;  %v729_v60 = vpop.f32.mrf.mxu1 }
 0x142   : > { %v991_v58 = vmul.f32 -1.442695, %v784_v54  ;;  %v791_v10 = vadd.f32 %v690_v50, %v448_v8 }
 0x143   : > { %v692_v51 = vpop.f32.mrf.mxu0  ;;  %v1028_v62 = vpop.f32.mrf.mxu1 }
 0x144   : > { %v992_v13 = vmul.f32 -1.442695, %v791_v10 }
 0x145   : > { %v693_v53 = vpop.f32.mrf.mxu0  ;;  %v732_v63 = vpop.f32.mrf.mxu1 }
 0x147   : > { %v778_v55 = vpop.f32.mrf.mxu0  ;;  %v1029_v0 = vpop.f32.mrf.mxu1 }
 0x148   : > { %v993_v56 = vmul.f32 -1.442695, %v778_v55 }
 0x149   : > { %v1034_v57 = vpop.f32.mrf.mxu0 }
 0x14a   : > { %1148 = vpow2.f32 %v993_v56 }
 0x14b   : > { %v781_v59 = vpop.f32.mrf.mxu0  ;;  %1150 = vpow2.f32 %v991_v58 }
 0x14d   : > { %v1035_v61 = vpop.f32.mrf.mxu0 }
 0x157   : > { %v1149_v1 = vpop.eup %1148 }
 0x158   : > { %v801_v2 = vadd.f32 1.0, %v1149_v1  ;;  %v1151_v4 = vpop.eup %1150 }
 0x159   : > { %v788_v7 = vadd.f32 1.0, %v1151_v4 }
 0x15a   : > { %1152 = vrcp.f32 %v801_v2 }
 0x15b   : > { %1154 = vrcp.f32 %v788_v7 }
 0x15c   : > { %1156 = vpow2.f32 %v992_v13 }
 0x167   : > { %v1153_v12 = vpop.eup %1152 }
 0x168   : > { %v804_v14 = vadd.f32 %v1153_v12, %v489_v11  ;;  %v1155_v17 = vpop.eup %1154 }
 0x169   : > { %v811_v19 = vmul.f32 %v1155_v17, %v729_v60  ;;  %v1157_v22 = vpop.eup %1156 }
 0x16a   : > { %v994_v15 = vmul.f32 -1.442695, %v804_v14  ;;  %v795_v25 = vadd.f32 1.0, %v1157_v22 }
 0x16b   : > { %v812_v21 = vadd.f32 %v811_v19, %v487_v20 }
 0x16c   : > { %1158 = vpow2.f32 %v994_v15 }
 0x16d   : > { %1160 = vtanh.f32 %v812_v21 }
 0x179   : > { %v1159_v23 = vpop.eup %1158 }
 0x17a   : > { %v808_v24 = vadd.f32 1.0, %v1159_v23  ;;  %v1161_v26 = vpop.eup %1160 }
 0x17c   : > { %1162 = vrcp.f32 %v808_v24 }
 0x17d   : > { %1164 = vrcp.f32 %v795_v25 }
 0x189   : > { %v1163_v28 = vpop.eup %1162 }
 0x18a   : > { %v814_v29 = vmul.f32 %v1163_v28, %v1161_v26  ;;  %v1165_v31 = vpop.eup %1164 }
 0x18c   : > { %v815_v30 = vsub.f32 %v1515_v27, %v814_v29 }
 0x18e   : > { %v816_v32 = vmul.f32 %v1165_v31, %v815_v30 }
 0x190   : > { %v817_v33 = vadd.f32 %v816_v32, %v814_v29 }
 0x192   : > { %818 = vst [vmem:[%s348_s4] sm:$0xff] %v817_v33 }
 0x193   : > { %1259 = shalt.err (!%p1256_p13)
}
 0x194   : > { %s1260_s13 = scalar_lea.hbm %s831_s22, 128  ;;  %s1264_s17 = scalar_lea.hbm %s1576_s7, 256 }
 0x195   : > { %p1261_p5 = scmp.ne.s32.totalorder %s831_s22, %s1260_s13  ;;  %p1265_p8 = scmp.lt.s32.totalorder %s831_s22, %s1576_s7 }
 0x196   : > { %p1266_p7 = scmp.lt.s32.totalorder %s1264_s17, %s1260_s13 }
 0x197   : > { %p1262_p10 = pnand %p1261_p5, %p1596_p1 }
 0x198   : > { %p1267_p11 = por %p1266_p7, %p1265_p8 }
 0x199   : > { %p1263_p4 = pneg %p1262_p10 }
 0x19b   : > { %p1268_p0 = pnand %p1267_p11, %p1263_p4 }
 0x19d   : > { %1271 = shalt.err (!%p1268_p0)
}
 0x19e   : > { %1046 = dma.vmem_to_hbm [thread:$0]  (%p1596_p1), %s834_s9, 128, %s831_s22, %s820_s23  }
 0x19f PF: > { %s845_s3 = sand.u32 1, %s1302_s24   ;;  %p1597_p2 = scmp.ne.s32.totalorder %s1584_s8, 0 }
 0x1a0   : > { %p1598_p6 = scmp.ge.s32.totalorder %s1314_s27, 2  ;;  %s846_s4 = scalar_lea.sflag [#allocation4], %s845_s3 }
 0x1a2   : > { %p1060_p12 = pnand %p1598_p6, %p1597_p2 }
 0x1a4   : > { %p1061_p3 = pneg %p1060_p12 }
 0x1a6   : > { %1297 = dma.done.wait (%p1061_p3), %s846_s4, 128  }
 0x1a7   : > { %1299 = vsyncadd (%p1061_p3), %s846_s4, 4294967168  ;;  %p21_p9 = scmp.ge.s32.totalorder %s1439_s10, 4   ;;  %s1599_s24 = smov %s1306_s25 }
 0x1a8   : > { %s1600_s25 = smov %s1310_s26  ;;  %s1601_s26 = smov %s1448_s15 }
 0x1a9   : > { %s1602_s27 = smov %s1439_s10  ;;  %23 = sbr.rel (!%p21_p9) target bundleno = 9 (0x9), region = 107 }
 0x1ae   :  { %851 = vsyncpa [#allocation3], 1 }
 0x1af   :  { %853 = vsyncpa [#allocation3 + $0x1], 1 }
 0x1b0   :  { %854 = vsyncpa [#allocation6], 1 }
 0x1b1   :  { %855 = vsyncpa [#allocation4], 1 }
 0x1b2   :  { %857 = vsyncpa [#allocation4 + $0x1], 1 }

// kernel: tpu_custom_call.1
= control target key start
LH: loop header
LB: loop body
LE: loop exit
PB: predicated region body
PF: predicated region fallthrough
CT: control target
= control target key end

     0   :  { %s1569_s0 = inlined_call_operand.vmem [shape: bf16[16,16], index: 0, kind: input, shape index: {}]   ;;  %s1570_s1 = inlined_call_operand.hbm [shape: f32[16,128], index: 1, kind: input, shape index: {}]   ;;  %s1571_s2 = inlined_call_operand.vmem [shape: bf16[16,8], index: 2, kind: input, shape index: {}]   ;;  %s1572_s3 = inlined_call_operand.hbm [shape: bf16[16,512], index: 3, kind: input, shape index: {}]   ;;  %s1573_s4 = inlined_call_operand.hbm [shape: bf16[128,384], index: 4, kind: input, shape index: {}]   ;;  %s1574_s5 = inlined_call_operand.vmem [shape: bf16[8,128], index: 5, kind: input, shape index: {}]   ;;  %s1575_s6 = inlined_call_operand.vmem [shape: f32[1,512], index: 6, kind: input, shape index: {}]   ;;  %s1576_s7 = inlined_call_operand.hbm [shape: f32[16,128], index: 7, kind: output, shape index: {}]  }
   0x1   :  { %1581 = sst [smem:[#allocation12_spill]] %s1572_s3 }
   0x2   :  { %1582 = sst [smem:[#allocation13_spill]] %s1573_s4 }
   0x3   :  { %12 = vsyncpa [#allocation3], 0 }
   0x4   :  { %14 = vsyncpa [#allocation3 + $0x1], 0 }
   0x5   :  { %15 = vsyncpa [#allocation6], 0 }
   0x6   :  { %16 = vsyncpa [#allocation4], 0 }
   0x7   :  { %18 = vsyncpa [#allocation4 + $0x1], 0  ;;  %s1367_s24 = smov 0   ;;  %s1369_s25 = smov 0  }
   0x8   :  { %s1371_s26 = smov 0   ;;  %s1373_s27 = smov 0  }
   0x9 LB: > { %s1388_s28 = sadd.s32 4294967295, %s1314_s27   ;;  %s946_s29 = sadd.s32 4294967294, %s1314_s27   ;;  %s1314_s27 = sphi %s1373_s27, %s1602_s27   ;;  %s1310_s26 = sphi %s1371_s26, %s1601_s26   ;;  %s1306_s25 = sphi %s1369_s25, %s1600_s25   ;;  %s1302_s24 = sphi %s1367_s24, %s1599_s24  }
   0xa   : > { %p70_p0 = scmp.ne.s32.totalorder %s1306_s25, %s1302_s24  ;;  %p1577_p1 = scmp.eq.s32.totalorder %s1388_s28, 0 }
   0xb   : > { %p210_p3 = scmp.eq.s32.totalorder %s946_s29, 1  ;;  %p947_p5 = scmp.ge.s32.totalorder %s1314_s27, 1 }
   0xc   : > { %p1397_p4 = por %p1577_p1, %p70_p0  ;;  %p217_p7 = scmp.lt.s32.totalorder %s1314_s27, 3 }
   0xd   : > { %p1402_p6 = por %p210_p3, %p70_p0  ;;  %s1316_s10 = smov [#allocation5]  }
   0xe   : > { %s1583_s30 = scalar_select %p1397_p4, 1, 0 }
   0xf   : > { %s1584_s8 = scalar_select %p1402_p6, 1, 0 }
  0x10   : > { %p1407_p8 = pnand %p947_p5, %p217_p7  ;;  %s229_s11 = sshll.u32 %s1316_s10, 4  ;;  %s230_s11 = int_to_ptr.vmem [resolvable:$true] %s229_s11 }
  0x11   : > { %s1317_s13 = smov [#allocation7]   ;;  %s1177_s15 = scalar_lea.vmem %s230_s11, 512 }
  0x12   : > { %s1585_s9 = scalar_select %p1407_p8, 1, 0 }
  0x13   : > { %p1048_p9 = pneg %p1407_p8  ;;  %s242_s14 = sshll.u32 %s1317_s13, 4  ;;  %s243_s14 = int_to_ptr.vmem [resolvable:$true] %s242_s14 }
  0x14   : > { %p1178_p13 = scmp.ne.s32.totalorder %s230_s11, %s1177_s15  ;;  %p1185_p5 = scmp.lt.s32.totalorder %s230_s11, %s230_s11 }
  0x15   : > { %p1416_p11 = pnand %p1048_p9, %p1577_p1  ;;  %p1186_p7 = scmp.lt.s32.totalorder %s1177_s15, %s1177_s15 }
  0x17   : > { %p1168_p12 = pneg %p1416_p11  ;;  %p1187_p10 = por %p1186_p7, %p1185_p5 }
  0x19   : > { %p1180_p0 = pnand %p1178_p13, %p1168_p12 }
  0x1b   : > { %p1181_p3 = pneg %p1180_p0 }
  0x1d   : > { %p1188_p9 = pnand %p1187_p10, %p1181_p3 }
  0x1f   : > { %1191 = shalt.err (!%p1188_p9)
}
  0x20   : > { %s1318_s16 = smov 256   ;;  %s1319_s17 = smov 16  }
  0x21   : > { %s1587_s3 = sld [smem:[#allocation12_spill]]  ;;  %s1203_s20 = scalar_lea.vmem %s243_s14, 3072 }
  0x22   : > { %p1204_p1 = scmp.ne.s32.totalorder %s243_s14, %s1203_s20  ;;  %p1211_p2 = scmp.lt.s32.totalorder %s243_s14, %s243_s14 }
  0x23   : > { %p1212_p6 = scmp.lt.s32.totalorder %s1203_s20, %s1203_s20 }
  0x24   : > { %p1206_p13 = pnand %p1204_p1, %p1168_p12 }
  0x25   : > { %p1213_p5 = por %p1212_p6, %p1211_p2 }
  0x26   : > { %p1207_p0 = pneg %p1206_p13 }
  0x27   : > { %1051 = dma.hbm_to_vmem [thread:$0]  (!%p1416_p11), %s1587_s3, 512, %s230_s11, [#allocation6], %s1318_s16, %s1318_s16, %s1319_s17  }
  0x28   : > { %p1214_p10 = pnand %p1213_p5, %p1207_p0 }
  0x2a   : > { %1217 = shalt.err (!%p1214_p10)
}
  0x2b   : > { %s1320_s21 = smov 192   ;;  %s1321_s22 = smov 12  }
  0x2c   : > { %s1588_s4 = sld [smem:[#allocation13_spill]]  ;;  %s1439_s10 = sadd.s32 1, %s1314_s27  }
  0x2d   : > { %s54_s11 = ssub.s32 %s1314_s27, %s1439_s10  ;;  %s57_s13 = sadd.s32 1, %s1310_s26 }
  0x2e   : > { %p55_p1 = scmp.eq.s32.totalorder %s54_s11, 0  ;;  %p64_p2 = scmp.ne.s32.totalorder %s1310_s26, %s1306_s25 }
  0x2f   : > { %p65_p6 = scmp.eq.s32.totalorder %s1314_s27, 0  ;;  %p1589_p3 = scmp.eq.s32.totalorder %s1388_s28, 1 }
  0x30   : > { %s1448_s15 = scalar_select %p55_p1, %s1310_s26, %s57_s13  }
  0x31   : > { %p66_p12 = por %p65_p6, %p64_p2  ;;  %p1452_p7 = por %p1589_p3, %p64_p2 }
  0x32   : > { %1054 = dma.hbm_to_vmem [thread:$0]  (!%p1416_p11), %s1588_s4, 3072, %s243_s14, [#allocation6], %s1320_s21, %s1320_s21, %s1321_s22  }
  0x33   : > { %s1590_s16 = scalar_select %p1452_p7, 1, 0 }
  0x34   : > { %p1065_p9 = scmp.lt.s32.totalorder %s1314_s27, 2  ;;  %s269_s12 = sand.u32 1, %s1310_s26  }
  0x35   : > { %s951_s17 = sshll.u32 %s269_s12, 3  ;;  %s952_s14 = sshll.u32 %s1314_s27, 7 }
  0x36   : > { %s1462_s20 = scalar_lea.hbm %s1570_s1, %s952_s14  ;;  %s273_s21 = scalar_lea.vmem [#allocation2], %s951_s17 }
  0x37   : > { %s280_s22 = sshll.u32 %s273_s21, 4  ;;  %p1464_p11 = pnand %p1065_p9, %p66_p12  ;;  %s281_s22 = int_to_ptr.vmem [resolvable:$true] %s280_s22 }
  0x38   : > { %s270_s29 = scalar_lea.sflag [#allocation3], %s269_s12  ;;  %s1218_s11 = scalar_lea.hbm %s1462_s20, 128 }
  0x39   : > { %p1219_p13 = scmp.ne.s32.totalorder %s1462_s20, %s1218_s11  ;;  %p1220_p0 = pneg %p1464_p11 }
  0x3a   : > { %s1223_s18 = scalar_lea.hbm %s1570_s1, 256  ;;  %p1224_p1 = scmp.lt.s32.totalorder %s1462_s20, %s1570_s1 }
  0x3b   : > { %p1221_p5 = pnand %p1220_p0, %p1219_p13  ;;  %p1225_p2 = scmp.lt.s32.totalorder %s1223_s18, %s1218_s11 }
  0x3d   : > { %p1222_p10 = pneg %p1221_p5  ;;  %p1226_p6 = por %p1225_p2, %p1224_p1 }
  0x3f   : > { %p1227_p12 = pnand %p1226_p6, %p1222_p10 }
  0x41   : > { %1230 = shalt.err (!%p1227_p12)
}
  0x42   : > { %s1231_s21 = scalar_lea.vmem %s281_s22, 128  ;;  %s1322_s12 = smov [#allocation2]  }
  0x43   : > { %p1232_p3 = scmp.ne.s32.totalorder %s281_s22, %s1231_s21  ;;  %s1236_s3 = sshll.u32 %s1322_s12, 4  ;;  %s1237_s3 = int_to_ptr.vmem [resolvable:$false] %s1236_s3 }
  0x44   : > { %s1238_s4 = scalar_lea.vmem %s1237_s3, 256  ;;  %p1239_p13 = scmp.lt.s32.totalorder %s281_s22, %s1237_s3 }
  0x45   : > { %p1234_p9 = pnand %p1232_p3, %p1220_p0  ;;  %p1240_p5 = scmp.lt.s32.totalorder %s1238_s4, %s1231_s21 }
  0x47   : > { %p1235_p7 = pneg %p1234_p9  ;;  %p1241_p4 = por %p1240_p5, %p1239_p13 }
  0x49   : > { %p1242_p8 = pnand %p1241_p4, %p1235_p7 }
  0x4b   : > { %1245 = shalt.err (!%p1242_p8)
}
  0x4c   : > { %1058 = dma.hbm_to_vmem [thread:$0]  (!%p1464_p11), %s1462_s20, 128, %s281_s22, %s270_s29  }
  0x4d   : > { %p1592_p10 = scmp.ne.s32.totalorder %s1585_s9, 0 }
  0x4e   : > { %s1485_s11 = sand.u32 (!%p1592_p10), 1, %s1306_s25   ;;  %p1593_p4 = scmp.ne.s32.totalorder (!%p1592_p10), %s1583_s30, 0 }
  0x4f   : > { %296 = sbr.rel (%p1592_p10) target bundleno = 415 (0x19f), region = 48  ;;  %s954_s13 = sshll.u32 (!%p1592_p10), %s1485_s11, 3 }
  0x50   : > { %s299_s3 = scalar_lea.sflag (!%p1592_p10), [#allocation3], %s1485_s11  ;;  %s1491_s4 = scalar_lea.vmem (!%p1592_p10), [#allocation2], %s954_s13 }
  0x54   : > { %1289 = dma.done.wait (%p1593_p4), %s299_s3, 128  }
  0x55   : > { %1291 = vsyncadd (%p1593_p4), %s299_s3, 4294967168  ;;  %p1594_p8 = scmp.eq.s32.totalorder %s1388_s28, 0 }
  0x57   : > { %1293 = dma.done.wait (%p1594_p8), [#allocation6], 3584   ;;  %p1595_p7 = pmov %p1594_p8 }
  0x58   : > { %p349_p11 = scmp.lt.s32.totalorder %s1388_s28, 1  ;;  %v1323_v0 = vmov 0   ;;  %v1110_v1 = vld [vmem:[#allocation5 + $0x4] ss:$16 sps:$4 sm:$0xff]   ;;  %v1112_v2 = vld [vmem:[#allocation5] ss:$16 sps:$4 sm:$0xff]   ;;  %v367_v44 = vlaneseq }
  0x59   : > { %1295 = vsyncadd (%p1595_p7), [#allocation6], 4294963712  ;;  %443 = vmatprep.mubr.bf16.mxu0 %v1323_v0  ;;  %484 = vmatprep.mubr.bf16.mxu1 %v1323_v0  ;;  %v1115_v4 = vld [vmem:[#allocation7 + $0xac] ss:$12 sps:$4 sm:$0xff]   ;;  %vm407_vm0 = vcmask 130048   ;;  %v1324_v16 = vmov 0.0  }
  0x5a   : > { %s1503_s9 = scalar_select %p349_p11, %s1388_s28, 1  ;;  %425 = vmatprep.subr.bf16.mxu0 %v1110_v1  ;;  %v1113_v5 = vld [vmem:[#allocation7 + $0xa8] ss:$12 sps:$4 sm:$0xff]   ;;  %v1116_v7 = vld [vmem:[#allocation7 + $0x90] ss:$12 sps:$4 sm:$0xff]   ;;  %vm1325_vm1 = vmmov 0  }
  0x5b   : > { %426 = vmatpush1.bf16.msra.mxu0 %v1112_v2  ;;  %v1118_v6 = vld [vmem:[#allocation7 + $0x94] ss:$12 sps:$4 sm:$0xff]   ;;  %v1121_v8 = vld [vmem:[#allocation7 + $0x7c] ss:$12 sps:$4 sm:$0xff]   ;;  %v1119_v9 = vld [vmem:[#allocation7 + $0x78] ss:$12 sps:$4 sm:$0xff]  }
  0x5c   : > { %s958_s20 = sshll.u32 %s1503_s9, 2  ;;  %654 = vmatprep.subr.bf16.mxu0 %v1115_v4  ;;  %v1124_v10 = vld [vmem:[#allocation7 + $0x64] ss:$12 sps:$4 sm:$0xff]   ;;  %v1137_v11 = vld [vmem:[#allocation5 + $0xc] ss:$16 sps:$4 sm:$0xff]   ;;  %vm740_vm2 = vcmask 1043456  }
  0x5d   : > { %s352_s23 = scalar_lea.vmem %s1569_s0, %s958_s20  ;;  %v1139_v12 = vld [vmem:[#allocation5 + $0x8] ss:$16 sps:$4 sm:$0xff]   ;;  %v1122_v13 = vld [vmem:[#allocation7 + $0x60] ss:$12 sps:$4 sm:$0xff]   ;;  %466 = vmatprep.subr.bf16.mxu1 %v1137_v11  ;;  %v1140_v15 = vld [vmem:[#allocation7 + $0xb0] ss:$12 sps:$4 sm:$0xff]   ;;  %s356_s17 = scalar_lea.vmem %s1571_s2, %s958_s20 }
  0x5e   : > { %v358_v3 = vld [vmem:[%s352_s23] sm:$0xf]  ;;  %v1127_v14 = vld [vmem:[#allocation7 + $0x4c] ss:$12 sps:$4 sm:$0xff]   ;;  %467 = vmatpush1.bf16.msra.mxu1 %v1139_v12  ;;  %v1125_v17 = vld [vmem:[#allocation7 + $0x48] ss:$12 sps:$4 sm:$0xff]  }
  0x5f   : > { %964 = vmatmul.mubr.msk.bf16.vlgmr.msra.gmra.mxu0 %vm407_vm0, %v358_v3  ;;  %1010 = vmatprep.subr.bf16.mxu1 %v1324_v16  ;;  %v1130_v18 = vld [vmem:[#allocation7 + $0x34] ss:$12 sps:$4 sm:$0xff]   ;;  %v1141_v19 = vld [vmem:[#allocation7 + $0x98] ss:$12 sps:$4 sm:$0xff]   ;;  %v1128_v20 = vld [vmem:[#allocation7 + $0x30] ss:$12 sps:$4 sm:$0xff]  }
  0x60   : > { %655 = vmatpush1.bf16.msra.mxu0 %v1113_v5  ;;  %686 = vmatprep.mubr.bf16.mxu0 %v1323_v0  ;;  %v1133_v21 = vld [vmem:[#allocation7 + $0x1c] ss:$12 sps:$4 sm:$0xff]   ;;  %v1142_v22 = vld [vmem:[#allocation7 + $0x80] ss:$12 sps:$4 sm:$0xff]   ;;  %v1131_v23 = vld [vmem:[#allocation7 + $0x18] ss:$12 sps:$4 sm:$0xff]  }
  0x61   : > { %656 = vmatprep.subr.bf16.mxu0 %v1118_v6  ;;  %965 = vmatmul.mubr.msk.bf16.vlgmr.msra.gmra.mxu1 %vm407_vm0, %v358_v3  ;;  %v1136_v24 = vld [vmem:[#allocation7 + $0x4] ss:$12 sps:$4 sm:$0xff]   ;;  %v1143_v25 = vld [vmem:[#allocation7 + $0x68] ss:$12 sps:$4 sm:$0xff]   ;;  %v1134_v26 = vld [vmem:[#allocation7] ss:$12 sps:$4 sm:$0xff]  }
  0x62   : > { %1011 = vmatpush3.bf16.msra.mxu1 %v1140_v15  ;;  %1026 = vmatprep.mubr.msk.bf16.mxu1 %vm1325_vm1, %v1324_v16  ;;  %v1515_v27 = vld [vmem:[%s1491_s4] sm:$0xff]  ;;  %v1146_v33 = vld [vmem:[#allocation7 + $0x20] ss:$12 sps:$4 sm:$0xff]   ;;  %vm736_vm3 = vcmask 64512   ;;  %v368_v45 = vshrl.u32 %v367_v44, 7  ;;  %s996_s3 = sshll.u32 %s1388_s28, 7 }
  0x63   : > { %1012 = vmatprep.subr.bf16.mxu1 %v1324_v16  ;;  %v1144_v28 = vld [vmem:[#allocation7 + $0x50] ss:$12 sps:$4 sm:$0xff]   ;;  %v493_v30 = vpack.c.bf16 %v1515_v27, %v1515_v27  ;;  %v1145_v32 = vld [vmem:[#allocation7 + $0x38] ss:$12 sps:$4 sm:$0xff]   ;;  %v1147_v35 = vld [vmem:[#allocation7 + $0x8] ss:$12 sps:$4 sm:$0xff]   ;;  %s831_s22 = scalar_lea.hbm %s1576_s7, %s996_s3 }
  0x64   : > { %657 = vmatpush1.bf16.msra.mxu0 %v1116_v7  ;;  %v735_v29 = vld [vmem:[%s1574_s5] sm:$0xf]  ;;  %v369_v46 = vsub.s32 0, %v368_v45  ;;  %v373_v3 = vsub.s32 1, %v368_v45  ;;  %v381_v6 = vsub.s32 3, %v368_v45  ;;  %s348_s4 = scalar_lea.vmem [#allocation8], %s954_s13 }
  0x65   : > { %658 = vmatprep.subr.bf16.mxu0 %v1121_v8  ;;  %v742_v31 = vsel %vm740_vm2, %v735_v29, 0  ;;  %v360_v34 = vld [vmem:[%s356_s17] sm:$0xf]  ;;  %s833_s9 = sshll.u32 %s348_s4, 4  ;;  %s820_s23 = scalar_lea.sflag [#allocation4], %s1485_s11  ;;  %s834_s9 = int_to_ptr.vmem [resolvable:$true] %s833_s9 }
  0x66   : > { %1013 = vmatpush3.bf16.msra.mxu1 %v1141_v19  ;;  %v365_v47 = vld [vmem:[%s1575_s6] sm:$0xf]  ;;  %s1246_s29 = scalar_lea.vmem %s834_s9, 128  ;;  %p1596_p1 = scmp.ne.s32.totalorder %s1590_s16, 0 }
  0x67   : > { %1014 = vmatprep.subr.bf16.mxu1 %v1324_v16  ;;  %v370_v49 = vrot.slane %v365_v47, %v369_v46  ;;  %v374_v5 = vrot.slane %v365_v47, %v373_v3  ;;  %p1247_p0 = scmp.ne.s32.totalorder %s834_s9, %s1246_s29  ;;  %s1326_s14 = smov [#allocation8]  }
  0x68   : > { %659 = vmatpush1.bf16.msra.mxu0 %v1119_v9  ;;  %v382_v9 = vrot.slane %v365_v47, %v381_v6  ;;  %s1250_s18 = sshll.u32 %s1326_s14, 4  ;;  %s1251_s18 = int_to_ptr.vmem [resolvable:$false] %s1250_s18 }
  0x69   : > { %660 = vmatprep.subr.bf16.mxu0 %v1124_v10  ;;  %p1248_p2 = pnand %p1247_p0, %p1596_p1  ;;  %s1252_s28 = scalar_lea.vmem %s1251_s18, 256 }
  0x6a   : > { %1015 = vmatpush3.bf16.msra.mxu1 %v1142_v22  ;;  %p1253_p12 = scmp.lt.s32.totalorder %s834_s9, %s1251_s18  ;;  %p1254_p3 = scmp.lt.s32.totalorder %s1252_s28, %s1246_s29 }
  0x6b   : > { %1016 = vmatprep.subr.bf16.mxu1 %v1324_v16  ;;  %p1249_p6 = pneg %p1248_p2 }
  0x6c   : > { %661 = vmatpush1.bf16.msra.mxu0 %v1122_v13  ;;  %p1255_p9 = por %p1254_p3, %p1253_p12 }
  0x6d   : > { %662 = vmatprep.subr.bf16.mxu0 %v1127_v14 }
  0x6e   : > { %1017 = vmatpush3.bf16.msra.mxu1 %v1143_v25  ;;  %p1256_p13 = pnand %p1255_p9, %p1249_p6 }
  0x6f   : > { %1018 = vmatprep.subr.bf16.mxu1 %v1324_v16 }
  0x70   : > { %663 = vmatpush1.bf16.msra.mxu0 %v1125_v17 }
  0x71   : > { %664 = vmatprep.subr.bf16.mxu0 %v1130_v18 }
  0x72   : > { %1019 = vmatpush3.bf16.msra.mxu1 %v1144_v28 }
  0x73   : > { %1020 = vmatprep.subr.bf16.mxu1 %v1324_v16 }
  0x74   : > { %665 = vmatpush1.bf16.msra.mxu0 %v1128_v20 }
  0x75   : > { %666 = vmatprep.subr.bf16.mxu0 %v1133_v21 }
  0x76   : > { %1021 = vmatpush3.bf16.msra.mxu1 %v1145_v32 }
  0x77   : > { %1022 = vmatprep.subr.bf16.mxu1 %v1324_v16 }
  0x78   : > { %667 = vmatpush1.bf16.msra.mxu0 %v1131_v23 }
  0x79   : > { %668 = vmatprep.subr.bf16.mxu0 %v1136_v24 }
  0x7a   : > { %1023 = vmatpush3.bf16.msra.mxu1 %v1146_v33 }
  0x7b   : > { %1024 = vmatprep.subr.bf16.mxu1 %v1324_v16 }
  0x7c   : > { %669 = vmatpush1.bf16.msra.mxu0 %v1134_v26 }
  0x7d   : > { %1030 = vmatprep.subr.bf16.mxu0 %v1324_v16 }
  0x7e   : > { %1025 = vmatpush3.bf16.msra.mxu1 %v1147_v35 }
  0x7f   : > { %687 = vmatmul.mubr.bf16.vlgmr.msra.gmra.mxu0 %v493_v30 }
  0x80   : > { %1031 = vmatpush3.bf16.msra.mxu0 %v742_v31  ;;  %1032 = vmatprep.mubr.msk.bf16.mxu0 %vm1325_vm1, %v1324_v16  ;;  %v377_v16 = vsub.s32 2, %v368_v45 }
  0x81   : > { %1027 = vmatmul.mubr.bf16.vlgmr.msra.gmra.mxu1 %v493_v30 }
  0x82   : > { %v378_v18 = vrot.slane %v365_v47, %v377_v16 }
  0x87   : > { %1033 = vmatmul.mubr.msk.bf16.vlgmr.msra.gmra.mxu0 %vm736_vm3, %v360_v34 }
 0x11f   : > { %v445_v36 = vpop.f32.mrf.mxu0 }
 0x120   : > { %v446_v52 = vadd.f32 %v445_v36, %v370_v49 }
 0x121   : > { %v447_v37 = vpop.f32.mrf.mxu0  ;;  %v486_v40 = vpop.f32.mrf.mxu1 }
 0x122   : > { %v448_v8 = vadd.f32 %v447_v37, %v374_v5  ;;  %v487_v20 = vadd.f32 %v486_v40, %v378_v18 }
 0x123   : > { %v449_v38 = vpop.f32.mrf.mxu0  ;;  %v488_v41 = vpop.f32.mrf.mxu1 }
 0x124   : > { %v489_v11 = vadd.f32 %v488_v41, %v382_v9 }
 0x125   : > { %v450_v39 = vpop.f32.mrf.mxu0  ;;  %v490_v42 = vpop.f32.mrf.mxu1 }
 0x127   : > { %v491_v43 = vpop.f32.mrf.mxu1 }
 0x13f   : > { %v688_v48 = vpop.f32.mrf.mxu0 }
 0x140   : > { %v784_v54 = vadd.f32 %v688_v48, %v446_v52 }
 0x141   : > { %v690_v50 = vpop.f32.mrf.mxu0  ;;  %v729_v60 = vpop.f32.mrf.mxu1 }
 0x142   : > { %v991_v58 = vmul.f32 -1.442695, %v784_v54  ;;  %v791_v10 = vadd.f32 %v690_v50, %v448_v8 }
 0x143   : > { %v692_v51 = vpop.f32.mrf.mxu0  ;;  %v1028_v62 = vpop.f32.mrf.mxu1 }
 0x144   : > { %v992_v13 = vmul.f32 -1.442695, %v791_v10 }
 0x145   : > { %v693_v53 = vpop.f32.mrf.mxu0  ;;  %v732_v63 = vpop.f32.mrf.mxu1 }
 0x147   : > { %v778_v55 = vpop.f32.mrf.mxu0  ;;  %v1029_v0 = vpop.f32.mrf.mxu1 }
 0x148   : > { %v993_v56 = vmul.f32 -1.442695, %v778_v55 }
 0x149   : > { %v1034_v57 = vpop.f32.mrf.mxu0 }
 0x14a   : > { %1148 = vpow2.f32 %v993_v56 }
 0x14b   : > { %v781_v59 = vpop.f32.mrf.mxu0  ;;  %1150 = vpow2.f32 %v991_v58 }
 0x14d   : > { %v1035_v61 = vpop.f32.mrf.mxu0 }
 0x157   : > { %v1149_v1 = vpop.eup %1148 }
 0x158   : > { %v801_v2 = vadd.f32 1.0, %v1149_v1  ;;  %v1151_v4 = vpop.eup %1150 }
 0x159   : > { %v788_v7 = vadd.f32 1.0, %v1151_v4 }
 0x15a   : > { %1152 = vrcp.f32 %v801_v2 }
 0x15b   : > { %1154 = vrcp.f32 %v788_v7 }
 0x15c   : > { %1156 = vpow2.f32 %v992_v13 }
 0x167   : > { %v1153_v12 = vpop.eup %1152 }
 0x168   : > { %v804_v14 = vadd.f32 %v1153_v12, %v489_v11  ;;  %v1155_v17 = vpop.eup %1154 }
 0x169   : > { %v811_v19 = vmul.f32 %v1155_v17, %v729_v60  ;;  %v1157_v22 = vpop.eup %1156 }
 0x16a   : > { %v994_v15 = vmul.f32 -1.442695, %v804_v14  ;;  %v795_v25 = vadd.f32 1.0, %v1157_v22 }
 0x16b   : > { %v812_v21 = vadd.f32 %v811_v19, %v487_v20 }
 0x16c   : > { %1158 = vpow2.f32 %v994_v15 }
 0x16d   : > { %1160 = vtanh.f32 %v812_v21 }
 0x179   : > { %v1159_v23 = vpop.eup %1158 }
 0x17a   : > { %v808_v24 = vadd.f32 1.0, %v1159_v23  ;;  %v1161_v26 = vpop.eup %1160 }
 0x17c   : > { %1162 = vrcp.f32 %v808_v24 }
 0x17d   : > { %1164 = vrcp.f32 %v795_v25 }
 0x189   : > { %v1163_v28 = vpop.eup %1162 }
 0x18a   : > { %v814_v29 = vmul.f32 %v1163_v28, %v1161_v26  ;;  %v1165_v31 = vpop.eup %1164 }
 0x18c   : > { %v815_v30 = vsub.f32 %v1515_v27, %v814_v29 }
 0x18e   : > { %v816_v32 = vmul.f32 %v1165_v31, %v815_v30 }
 0x190   : > { %v817_v33 = vadd.f32 %v816_v32, %v814_v29 }
 0x192   : > { %818 = vst [vmem:[%s348_s4] sm:$0xff] %v817_v33 }
 0x193   : > { %1259 = shalt.err (!%p1256_p13)
}
 0x194   : > { %s1260_s13 = scalar_lea.hbm %s831_s22, 128  ;;  %s1264_s17 = scalar_lea.hbm %s1576_s7, 256 }
 0x195   : > { %p1261_p5 = scmp.ne.s32.totalorder %s831_s22, %s1260_s13  ;;  %p1265_p8 = scmp.lt.s32.totalorder %s831_s22, %s1576_s7 }
 0x196   : > { %p1266_p7 = scmp.lt.s32.totalorder %s1264_s17, %s1260_s13 }
 0x197   : > { %p1262_p10 = pnand %p1261_p5, %p1596_p1 }
 0x198   : > { %p1267_p11 = por %p1266_p7, %p1265_p8 }
 0x199   : > { %p1263_p4 = pneg %p1262_p10 }
 0x19b   : > { %p1268_p0 = pnand %p1267_p11, %p1263_p4 }
 0x19d   : > { %1271 = shalt.err (!%p1268_p0)
}
 0x19e   : > { %1046 = dma.vmem_to_hbm [thread:$0]  (%p1596_p1), %s834_s9, 128, %s831_s22, %s820_s23  }
 0x19f PF: > { %s845_s3 = sand.u32 1, %s1302_s24   ;;  %p1597_p2 = scmp.ne.s32.totalorder %s1584_s8, 0 }
 0x1a0   : > { %p1598_p6 = scmp.ge.s32.totalorder %s1314_s27, 2  ;;  %s846_s4 = scalar_lea.sflag [#allocation4], %s845_s3 }
 0x1a2   : > { %p1060_p12 = pnand %p1598_p6, %p1597_p2 }
 0x1a4   : > { %p1061_p3 = pneg %p1060_p12 }
 0x1a6   : > { %1297 = dma.done.wait (%p1061_p3), %s846_s4, 128  }
 0x1a7   : > { %1299 = vsyncadd (%p1061_p3), %s846_s4, 4294967168  ;;  %p21_p9 = scmp.ge.s32.totalorder %s1439_s10, 4   ;;  %s1599_s24 = smov %s1306_s25 }
 0x1a8   : > { %s1600_s25 = smov %s1310_s26  ;;  %s1601_s26 = smov %s1448_s15 }
 0x1a9   : > { %s1602_s27 = smov %s1439_s10  ;;  %23 = sbr.rel (!%p21_p9) target bundleno = 9 (0x9), region = 107 }
 0x1ae   :  { %851 = vsyncpa [#allocation3], 1 }
 0x1af   :  { %853 = vsyncpa [#allocation3 + $0x1], 1 }
 0x1b0   :  { %854 = vsyncpa [#allocation6], 1 }
 0x1b1   :  { %855 = vsyncpa [#allocation4], 1 }
 0x1b2   :  { %857 = vsyncpa [#allocation4 + $0x1], 1 }

</bundles_post_ra>
